<compile_context>
chip_gen: v7x
topology: tpu7x:2x2x1
jax: 0.10.0
libtpu: 0.0.40
codegen_flags: <defaults>
</compile_context>

<pallas_src>
import jax
import jax.numpy as jnp
from jax.experimental import pallas as pl
from jax.experimental.pallas import tpu as pltpu

C_IN = 24
C_OUT = 72
BN_EPS = 1e-5


def conv_bn_relu_kernel(x_ref, w_ref, gamma_ref, beta_ref, o_ref):
    # x_ref:     (N, C_IN, HW)   f32   (whole array, VMEM)
    # w_ref:     (C_OUT, C_IN)   f32   (native Conv2d 1x1 weight layout)
    # gamma_ref: (C_OUT, 1)      f32
    # beta_ref:  (C_OUT, 1)      f32
    # o_ref:     (N, C_OUT, HW)  f32
    w = w_ref[...]
    n, _, hw = x_ref.shape

    # 1x1 conv == (C_OUT, C_IN) @ (C_IN, HW) per image.  BN statistics are
    # accumulated in the matmul epilogue while y_b is hot (no scratch buffer,
    # no second full-tensor read for the stats pass).
    s = jnp.zeros((C_OUT, 1), jnp.float32)
    ss = jnp.zeros((C_OUT, 1), jnp.float32)
    for b in range(n):  # static, tiny batch
        y_b = jnp.dot(w, x_ref[b], preferred_element_type=jnp.float32)  # (C_OUT, HW)
        s = s + jnp.sum(y_b, axis=-1, keepdims=True)
        ss = ss + jnp.sum(y_b * y_b, axis=-1, keepdims=True)
        o_ref[b] = y_b

    # Training-mode BatchNorm forward: biased batch statistics over (N, H, W).
    inv_m = jnp.float32(1.0 / (n * hw))
    mean = s * inv_m                                            # (C_OUT, 1)
    var = jnp.maximum(ss * inv_m - mean * mean, jnp.float32(0.0))
    inv_std = jax.lax.rsqrt(var + jnp.float32(BN_EPS))

    scale = gamma_ref[...] * inv_std                            # (C_OUT, 1)
    shift = beta_ref[...] - mean * scale                        # (C_OUT, 1)

    # Single fused scale+shift+ReLU pass, in place on the output block.
    for b in range(n):
        o_ref[b] = jnp.maximum(o_ref[b] * scale + shift, jnp.float32(0.0))


def conv_bn_relu(x_nchw, weight, gamma, beta):
    """x_nchw: (N, 24, H, W); weight: (72, 24, 1, 1) or (72, 24); gamma/beta: (72,)."""
    n, c, h, w = x_nchw.shape
    assert c == C_IN
    hw = h * w

    # Free reshapes only — no transposes anywhere in the wrapper.
    x3d = x_nchw.reshape(n, C_IN, hw).astype(jnp.float32)
    w2d = weight.reshape(C_OUT, C_IN).astype(jnp.float32)
    g2d = gamma.reshape(C_OUT, 1).astype(jnp.float32)
    b2d = beta.reshape(C_OUT, 1).astype(jnp.float32)

    # Generation-aware VMEM budget for the single-block (no-grid) fast path:
    # single-buffered whole-array operands + a couple of (C_OUT, HW) temporaries.
    hw_pad = ((hw + 127) // 128) * 128
    vmem_bytes = 4 * (n * C_IN * hw_pad + n * C_OUT * hw_pad      # x + out
                      + 2 * C_OUT * hw_pad                        # matmul / normalize temps
                      + C_OUT * C_IN + 4 * C_OUT)                 # weight + per-channel vectors
    try:
        vmem_cap = int(pltpu.get_tpu_info().vmem_capacity_bytes)
    except Exception:
        vmem_cap = 64 * 1024 * 1024  # v7x per-core worst case
    budget = (vmem_cap * 3) // 4
    # TODO(synk): for inputs past this budget, tile the HW axis with a "parallel"
    # grid (lane-dense tiles >= 512, multiple of 128) and a two-pass BN
    # (partial sum/sum-sq kernel, then normalize) so v7x's second TensorCore is used.
    assert vmem_bytes <= budget, "input too large for single-block kernel"
    vmem_limit = int(min(max(2 * vmem_bytes, 32 * 1024 * 1024), budget))

    out3d = pl.pallas_call(
        conv_bn_relu_kernel,
        out_shape=jax.ShapeDtypeStruct((n, C_OUT, hw), jnp.float32),
        in_specs=[
            pl.BlockSpec(memory_space=pltpu.MemorySpace.VMEM),
            pl.BlockSpec(memory_space=pltpu.MemorySpace.VMEM),
            pl.BlockSpec(memory_space=pltpu.MemorySpace.VMEM),
            pl.BlockSpec(memory_space=pltpu.MemorySpace.VMEM),
        ],
        out_specs=pl.BlockSpec(memory_space=pltpu.MemorySpace.VMEM),
        cost_estimate=pl.CostEstimate(
            flops=2 * n * hw * C_IN * C_OUT,
            transcendentals=C_OUT,
            bytes_accessed=4 * (n * C_IN * hw + C_IN * C_OUT + 2 * C_OUT
                                + n * C_OUT * hw),
        ),
        compiler_params=pltpu.CompilerParams(vmem_limit_bytes=vmem_limit),
    )(x3d, w2d, g2d, b2d)

    # TODO(synk): BatchNorm running_mean/running_var momentum update (training
    # bookkeeping) is not computed — it does not affect the forward output.
    return out3d.reshape(n, C_OUT, h, w)


def _reference(x_nchw, weight, gamma, beta):
    w2d = weight.reshape(C_OUT, C_IN)
    y = jnp.einsum("oc,nchw->nohw", w2d, x_nchw)
    mean = jnp.mean(y, axis=(0, 2, 3), keepdims=True)
    var = jnp.mean((y - mean) ** 2, axis=(0, 2, 3), keepdims=True)
    z = (y - mean) / jnp.sqrt(var + BN_EPS)
    z = z * gamma.reshape(1, C_OUT, 1, 1) + beta.reshape(1, C_OUT, 1, 1)
    return jnp.maximum(z, 0.0)


if __name__ == "__main__":
    key = jax.random.PRNGKey(0)
    k_x1, k_x2, k_w, k_g, k_b = jax.random.split(key, 5)

    weight = 0.1 * jax.random.normal(k_w, (C_OUT, C_IN, 1, 1), dtype=jnp.float32)
    gamma = 1.0 + 0.05 * jax.random.normal(k_g, (C_OUT,), dtype=jnp.float32)
    beta = 0.05 * jax.random.normal(k_b, (C_OUT,), dtype=jnp.float32)

    ok = True
    # Case 1: spec shape (1, 24, 28, 28)
    x1 = jax.random.normal(k_x1, (1, C_IN, 28, 28), dtype=jnp.float32)
    out1 = jax.block_until_ready(conv_bn_relu(x1, weight, gamma, beta))
    ref1 = _reference(x1, weight, gamma, beta)
    ok &= out1.shape == (1, C_OUT, 28, 28)
    ok &= bool(jnp.allclose(out1, ref1, atol=2e-3, rtol=2e-3))

    # Case 2: small batched shape (2, 24, 16, 16)
    x2 = jax.random.normal(k_x2, (2, C_IN, 16, 16), dtype=jnp.float32)
    out2 = jax.block_until_ready(conv_bn_relu(x2, weight, gamma, beta))
    ref2 = _reference(x2, weight, gamma, beta)
    ok &= out2.shape == (2, C_OUT, 16, 16)
    ok &= bool(jnp.allclose(out2, ref2, atol=2e-3, rtol=2e-3))

    assert ok
    print("KERNEL_OK")
</pallas_src>

<mosaic_0001>
module attributes {stable_mosaic.version = 11 : i64} {
  func.func @conv_bn_relu_kernel(%arg0: memref<1x24x784xf32, #tpu.memory_space<vmem>>, %arg1: memref<72x24xf32, #tpu.memory_space<vmem>>, %arg2: memref<72x1xf32, #tpu.memory_space<vmem>>, %arg3: memref<72x1xf32, #tpu.memory_space<vmem>>, %arg4: memref<1x72x784xf32, #tpu.memory_space<vmem>>) attributes {dimension_semantics = [], scalar_prefetch = 0 : i64, scratch_operands = 0 : i64, tpu.core_type = #tpu.core_type<tc>} {
    %c0 = arith.constant 0 : index
    %c0_0 = arith.constant 0 : index
    %0 = vector.load %arg1[%c0, %c0_0] : memref<72x24xf32, #tpu.memory_space<vmem>>, vector<72x24xf32>
    %cst = arith.constant 0.000000e+00 : f32
    %1 = vector.broadcast %cst : f32 to vector<72x1xf32>
    %cst_1 = arith.constant 0.000000e+00 : f32
    %2 = vector.broadcast %cst_1 : f32 to vector<72x1xf32>
    %c0_2 = arith.constant 0 : index
    %c0_3 = arith.constant 0 : index
    %c0_4 = arith.constant 0 : index
    %3 = vector.load %arg0[%c0_2, %c0_3, %c0_4] : memref<1x24x784xf32, #tpu.memory_space<vmem>>, vector<1x24x784xf32>
    %4 = vector.shape_cast %3 : vector<1x24x784xf32> to vector<24x784xf32>
    %cst_5 = arith.constant dense<0.000000e+00> : vector<72x784xf32>
    %5 = tpu.matmul %0, %4, %cst_5 {dimension_numbers = #tpu.dot_dimension_numbers<[1], [0], [0], [1], [0, 0, 1, 1], [], []>} : vector<72x24xf32>, vector<24x784xf32>, vector<72x784xf32> -> vector<72x784xf32>
    %cst_6 = arith.constant dense<0.000000e+00> : vector<72xf32>
    %6 = vector.multi_reduction <add>, %5, %cst_6 [1] : vector<72x784xf32> to vector<72xf32>
    %7 = vector.shape_cast %6 : vector<72xf32> to vector<72x1xf32>
    %8 = arith.addf %1, %7 : vector<72x1xf32>
    %9 = arith.mulf %5, %5 : vector<72x784xf32>
    %cst_7 = arith.constant dense<0.000000e+00> : vector<72xf32>
    %10 = vector.multi_reduction <add>, %9, %cst_7 [1] : vector<72x784xf32> to vector<72xf32>
    %11 = vector.shape_cast %10 : vector<72xf32> to vector<72x1xf32>
    %12 = arith.addf %2, %11 : vector<72x1xf32>
    %c0_8 = arith.constant 0 : index
    %c0_9 = arith.constant 0 : index
    %c0_10 = arith.constant 0 : index
    %13 = vector.load %arg4[%c0_8, %c0_9, %c0_10] : memref<1x72x784xf32, #tpu.memory_space<vmem>>, vector<1x72x784xf32>
    %14 = vector.shape_cast %13 : vector<1x72x784xf32> to vector<72x784xf32>
    %15 = vector.shape_cast %5 : vector<72x784xf32> to vector<1x72x784xf32>
    tpu.vector_store %arg4[%c0_8, %c0_9, %c0_10], %15 {strides = array<i32>} : memref<1x72x784xf32, #tpu.memory_space<vmem>>, vector<1x72x784xf32>,
    %cst_11 = arith.constant 0.00127551018 : f32
    %16 = vector.broadcast %cst_11 : f32 to vector<72x1xf32>
    %17 = arith.mulf %8, %16 : vector<72x1xf32>
    %cst_12 = arith.constant 0.00127551018 : f32
    %18 = vector.broadcast %cst_12 : f32 to vector<72x1xf32>
    %19 = arith.mulf %12, %18 : vector<72x1xf32>
    %20 = arith.mulf %17, %17 : vector<72x1xf32>
    %21 = arith.subf %19, %20 : vector<72x1xf32>
    %cst_13 = arith.constant 0.000000e+00 : f32
    %22 = vector.broadcast %cst_13 : f32 to vector<72x1xf32>
    %23 = arith.maximumf %21, %22 : vector<72x1xf32>
    %cst_14 = arith.constant 9.99999974E-6 : f32
    %24 = vector.broadcast %cst_14 : f32 to vector<72x1xf32>
    %25 = arith.addf %23, %24 : vector<72x1xf32>
    %26 = math.rsqrt %25 : vector<72x1xf32>
    %c0_15 = arith.constant 0 : index
    %c0_16 = arith.constant 0 : index
    %27 = vector.load %arg2[%c0_15, %c0_16] : memref<72x1xf32, #tpu.memory_space<vmem>>, vector<72x1xf32>
    %28 = arith.mulf %27, %26 : vector<72x1xf32>
    %c0_17 = arith.constant 0 : index
    %c0_18 = arith.constant 0 : index
    %29 = vector.load %arg3[%c0_17, %c0_18] : memref<72x1xf32, #tpu.memory_space<vmem>>, vector<72x1xf32>
    %30 = arith.mulf %17, %28 : vector<72x1xf32>
    %31 = arith.subf %29, %30 : vector<72x1xf32>
    %c0_19 = arith.constant 0 : index
    %c0_20 = arith.constant 0 : index
    %c0_21 = arith.constant 0 : index
    %32 = vector.load %arg4[%c0_19, %c0_20, %c0_21] : memref<1x72x784xf32, #tpu.memory_space<vmem>>, vector<1x72x784xf32>
    %33 = vector.shape_cast %32 : vector<1x72x784xf32> to vector<72x784xf32>
    %34 = vector.broadcast %28 : vector<72x1xf32> to vector<72x784xf32>
    %35 = arith.mulf %33, %34 : vector<72x784xf32>
    %36 = vector.broadcast %31 : vector<72x1xf32> to vector<72x784xf32>
    %37 = arith.addf %35, %36 : vector<72x784xf32>
    %cst_22 = arith.constant 0.000000e+00 : f32
    %38 = vector.broadcast %cst_22 : f32 to vector<72x784xf32>
    %39 = arith.maximumf %37, %38 : vector<72x784xf32>
    %c0_23 = arith.constant 0 : index
    %c0_24 = arith.constant 0 : index
    %c0_25 = arith.constant 0 : index
    %40 = vector.load %arg4[%c0_23, %c0_24, %c0_25] : memref<1x72x784xf32, #tpu.memory_space<vmem>>, vector<1x72x784xf32>
    %41 = vector.shape_cast %40 : vector<1x72x784xf32> to vector<72x784xf32>
    %42 = vector.shape_cast %39 : vector<72x784xf32> to vector<1x72x784xf32>
    tpu.vector_store %arg4[%c0_23, %c0_24, %c0_25], %42 {strides = array<i32>} : memref<1x72x784xf32, #tpu.memory_space<vmem>>, vector<1x72x784xf32>,
    return
  }
}

</mosaic_0001>

<bundles_post_ra>
// kernel: tpu_custom_call.1
= control target key start
LH: loop header
LB: loop body
LE: loop exit
PB: predicated region body
PF: predicated region fallthrough
CT: control target
= control target key end

     0   :  { %v1526_v7 = vmov 0.0   ;;  %vm48_vm0 = vcmask 195584   ;;  %s2107_s0 = inlined_call_operand.vmem [shape: f32[1,24,784], index: 0, kind: input, shape index: {}]   ;;  %s2108_s1 = inlined_call_operand.vmem [shape: f32[72,24], index: 1, kind: input, shape index: {}]   ;;  %s2109_s2 = inlined_call_operand.vmem [shape: f32[72,1], index: 2, kind: input, shape index: {}]   ;;  %s2110_s3 = inlined_call_operand.vmem [shape: f32[72,1], index: 3, kind: input, shape index: {}]   ;;  %s2111_s4 = inlined_call_operand.hbm [shape: f32[1,72,784], index: 4, kind: output, shape index: {}]  }
   0x1   :  { %v28_v0 = vld [vmem:[%s2107_s0 + $0x8] sm:$0xff]  ;;  %v35_v1 = vld [vmem:[%s2107_s0 + $0x40] sm:$0xff]  ;;  %v34_v4 = vld [vmem:[%s2107_s0 + $0x38] sm:$0xff]  ;;  %140 = vmatprep.mubr.f32.mxu0 %v1526_v7  ;;  %259 = vmatprep.mubr.f32.mxu1 %v1526_v7 }
   0x2   :  { %v27_v2 = vld [vmem:[%s2107_s0] sm:$0xff]  ;;  %v1460_v3 = vpack.c.bf16 %v35_v1, %v28_v0  ;;  %v30_v5 = vld [vmem:[%s2107_s0 + $0x18] sm:$0xff]  ;;  %v37_v6 = vld [vmem:[%s2107_s0 + $0x50] sm:$0xff] }
   0x3   :  { %v1462_v8 = vpack.c.bf16 %v34_v4, %v27_v2  ;;  %v1464_v9 = vpack.c.bf16 %v37_v6, %v30_v5  ;;  %v42_v10 = vld [vmem:[%s2107_s0 + $0x78] sm:$0xff]  ;;  %v29_v11 = vld [vmem:[%s2107_s0 + $0x10] sm:$0xff]  ;;  %v36_v12 = vld [vmem:[%s2107_s0 + $0x48] sm:$0xff] }
   0x4   :  { %1461 = vmatprep.subr.bf16.mxu0 %v1460_v3  ;;  %v1466_v13 = vpack.c.bf16 %v36_v12, %v29_v11  ;;  %v32_v14 = vld [vmem:[%s2107_s0 + $0x28] sm:$0xff]  ;;  %v39_v15 = vld [vmem:[%s2107_s0 + $0x60] sm:$0xff]  ;;  %v41_v18 = vld [vmem:[%s2107_s0 + $0x70] sm:$0xff] }
   0x5   :  { %1463 = vmatpush1.bf16.msra.mxu0 %v1462_v8  ;;  %1465 = vmatprep.subr.bf16.mxu1 %v1464_v9  ;;  %v44_v16 = vld [vmem:[%s2107_s0 + $0x88] sm:$0xff]  ;;  %v31_v17 = vld [vmem:[%s2107_s0 + $0x20] sm:$0xff]  ;;  %v1468_v19 = vpack.c.bf16 %v39_v15, %v32_v14  ;;  %v38_v20 = vld [vmem:[%s2107_s0 + $0x58] sm:$0xff] }
   0x6   :  { %80 = vmatprep.subr.mxu0 %v42_v10  ;;  %1467 = vmatpush1.bf16.msra.mxu1 %v1466_v13  ;;  %v1608_v21 = vld [vmem:[%s2108_s1] sm:$0xff]  ;;  %v1470_v22 = vpack.c.bf16 %v38_v20, %v31_v17  ;;  %v33_v23 = vld [vmem:[%s2107_s0 + $0x30] sm:$0xff]  ;;  %v40_v24 = vld [vmem:[%s2107_s0 + $0x68] sm:$0xff] }
   0x7   :  { %199 = vmatprep.subr.mxu1 %v44_v16  ;;  %v43_v25 = vld [vmem:[%s2107_s0 + $0x80] sm:$0xff]  ;;  %v1473_v26 = vpack.c.bf16 %v40_v24, %v33_v23  ;;  %v19_v27 = vld [vmem:[%s2108_s1 + $0x8] sm:$0xff] }
   0x9   :  { %81 = vmatpush1.msra.mxu0 %v41_v18 }
   0xa   :  { %1379 = vmatmul.mubr.msk.f32.vlgmr.msra.gmra.mrb[0].mxu0 %vm48_vm0, %v1608_v21  ;;  %1469 = vmatprep.subr.bf16.mxu0 %v1468_v19 }
   0xb   :  { %1471 = vmatpush1.bf16.msra.mxu0 %v1470_v22  ;;  %200 = vmatpush1.msra.mxu1 %v43_v25 }
   0xc   :  { %9 = vsyncpa [#allocation3], 0  ;;  %146 = vmatprep.mubr.f32.mxu0 %v1526_v7  ;;  %1388 = vmatmul.mubr.msk.f32.vlgmr.msra.gmra.mrb[0].mxu1 %vm48_vm0, %v1608_v21  ;;  %v46_v28 = vld [vmem:[%s2107_s0 + $0x98] sm:$0xff]  ;;  %v1527_v29 = vmov 0.0|0.0   ;;  %v45_v30 = vld [vmem:[%s2107_s0 + $0x90] sm:$0xff]  ;;  %vm1528_vm1 = vmmov 0  }
   0xd   :  { %1472 = vmatprep.subr.bf16.mxu1 %v1527_v29  ;;  %265 = vmatprep.mubr.f32.mxu1 %v1526_v7  ;;  %v20_v31 = vld [vmem:[%s2108_s1 + $0x10] sm:$0xff]  ;;  %v47_v32 = vld [vmem:[%s2107_s0 + $0xa0] sm:$0xff]  ;;  %v21_v33 = vld [vmem:[%s2108_s1 + $0x18] sm:$0xff]  ;;  %vm548_vm2 = vcmask 130048  }
   0xe   :  { %1380 = vmatmul.mubr.msk.f32.gmra.mrb[2].mxu0 %vm48_vm0, %v19_v27  ;;  %1474 = vmatpush3.bf16.msra.mxu1 %v1473_v26  ;;  %v22_v34 = vld [vmem:[%s2108_s1 + $0x20] sm:$0xff]  ;;  %v23_v35 = vld [vmem:[%s2108_s1 + $0x28] sm:$0xff]  ;;  %v24_v36 = vld [vmem:[%s2108_s1 + $0x30] sm:$0xff] }
   0xf   :  { %152 = vmatprep.mubr.f32.mxu0 %v1526_v7  ;;  %318 = vmatprep.subr.mxu0 %v46_v28  ;;  %v25_v37 = vld [vmem:[%s2108_s1 + $0x38] sm:$0xff]  ;;  %v26_v38 = vld [vmem:[%s2108_s1 + $0x40] sm:$0xff] }
  0x10   :  { %1389 = vmatmul.mubr.msk.f32.gmra.mrb[2].mxu1 %vm48_vm0, %v19_v27  ;;  %319 = vmatpush1.msra.mxu0 %v45_v30 }
  0x11   :  { %271 = vmatprep.mubr.f32.mxu1 %v1526_v7  ;;  %1431 = vmatprep.subr.mxu1 %v1526_v7 }
  0x12   :  { %1381 = vmatmul.mubr.msk.f32.gmra.mrb[4].mxu0 %vm48_vm0, %v20_v31  ;;  %1432 = vmatpush3.msra.mxu1 %v47_v32 }
  0x13   :  { %158 = vmatprep.mubr.f32.mxu0 %v1526_v7 }
  0x14   :  { %1390 = vmatmul.mubr.msk.f32.gmra.mrb[4].mxu1 %vm48_vm0, %v20_v31 }
  0x15   :  { %277 = vmatprep.mubr.f32.mxu1 %v1526_v7 }
  0x16   :  { %1382 = vmatmul.mubr.msk.f32.gmra.mrb[6].mxu0 %vm48_vm0, %v21_v33 }
  0x17   :  { %164 = vmatprep.mubr.f32.mxu0 %v1526_v7 }
  0x18   :  { %1391 = vmatmul.mubr.msk.f32.gmra.mrb[6].mxu1 %vm48_vm0, %v21_v33 }
  0x19   :  { %283 = vmatprep.mubr.f32.mxu1 %v1526_v7 }
  0x1a   :  { %1383 = vmatmul.mubr.msk.f32.gmra.mrb[8].mxu0 %vm48_vm0, %v22_v34 }
  0x1b   :  { %170 = vmatprep.mubr.f32.mxu0 %v1526_v7 }
  0x1c   :  { %1392 = vmatmul.mubr.msk.f32.gmra.mrb[8].mxu1 %vm48_vm0, %v22_v34 }
  0x1d   :  { %289 = vmatprep.mubr.f32.mxu1 %v1526_v7 }
  0x1e   :  { %1384 = vmatmul.mubr.msk.f32.gmra.mrb[10].mxu0 %vm48_vm0, %v23_v35 }
  0x1f   :  { %176 = vmatprep.mubr.f32.mxu0 %v1526_v7 }
  0x20   :  { %1393 = vmatmul.mubr.msk.f32.gmra.mrb[10].mxu1 %vm48_vm0, %v23_v35 }
  0x21   :  { %295 = vmatprep.mubr.f32.mxu1 %v1526_v7 }
  0x22   :  { %1385 = vmatmul.mubr.msk.f32.gmra.mrb[12].mxu0 %vm48_vm0, %v24_v36 }
  0x23   :  { %182 = vmatprep.mubr.f32.mxu0 %v1526_v7 }
  0x24   :  { %1394 = vmatmul.mubr.msk.f32.gmra.mrb[12].mxu1 %vm48_vm0, %v24_v36 }
  0x25   :  { %301 = vmatprep.mubr.f32.mxu1 %v1526_v7 }
  0x26   :  { %1386 = vmatmul.mubr.msk.f32.gmra.mrb[14].mxu0 %vm48_vm0, %v25_v37 }
  0x27   :  { %188 = vmatprep.mubr.f32.mxu0 %v1526_v7 }
  0x28   :  { %1395 = vmatmul.mubr.msk.f32.gmra.mrb[14].mxu1 %vm48_vm0, %v25_v37 }
  0x29   :  { %307 = vmatprep.mubr.f32.mxu1 %v1526_v7 }
  0x2a   :  { %1387 = vmatmul.mubr.msk.f32.gmra.mrb[16].mxu0 %vm48_vm0, %v26_v38 }
  0x2b   :  { %378 = vmatprep.mubr.f32.mxu0 %v1526_v7 }
  0x2c   :  { %1396 = vmatmul.mubr.msk.f32.gmra.mrb[16].mxu1 %vm48_vm0, %v26_v38 }
  0x2d   :  { %1433 = vmatprep.mubr.msk.f32.mxu1 %vm1528_vm1, %v1526_v7 }
  0x2e   :  { %1397 = vmatmul.mubr.msk.f32.vlgmr.msra.gmra.mrb[18].mxu0 %vm48_vm0, %v1608_v21 }
  0x2f   :  { %384 = vmatprep.mubr.f32.mxu0 %v1526_v7 }
  0x30   :  { %1434 = vmatmul.mubr.msk.f32.vlgmr.msra.gmra.mrb[18].mxu1 %vm48_vm0, %v1608_v21 }
  0x31   :  { %1436 = vmatprep.mubr.msk.f32.mxu1 %vm1528_vm1, %v1526_v7 }
  0x32   :  { %1398 = vmatmul.mubr.msk.f32.gmra.mrb[20].mxu0 %vm48_vm0, %v19_v27 }
  0x33   :  { %390 = vmatprep.mubr.f32.mxu0 %v1526_v7 }
  0x34   :  { %1437 = vmatmul.mubr.msk.f32.gmra.mrb[20].mxu1 %vm48_vm0, %v19_v27 }
  0x35   :  { %1439 = vmatprep.mubr.msk.f32.mxu1 %vm1528_vm1, %v1526_v7 }
  0x36   :  { %1399 = vmatmul.mubr.msk.f32.gmra.mrb[22].mxu0 %vm48_vm0, %v20_v31 }
  0x37   :  { %396 = vmatprep.mubr.f32.mxu0 %v1526_v7 }
  0x38   :  { %1440 = vmatmul.mubr.msk.f32.gmra.mrb[22].mxu1 %vm48_vm0, %v20_v31 }
  0x39   :  { %1442 = vmatprep.mubr.msk.f32.mxu1 %vm1528_vm1, %v1526_v7 }
  0x3a   :  { %1400 = vmatmul.mubr.msk.f32.gmra.mrb[24].mxu0 %vm48_vm0, %v21_v33 }
  0x3b   :  { %402 = vmatprep.mubr.f32.mxu0 %v1526_v7 }
  0x3c   :  { %1443 = vmatmul.mubr.msk.f32.gmra.mrb[24].mxu1 %vm48_vm0, %v21_v33 }
  0x3d   :  { %1445 = vmatprep.mubr.msk.f32.mxu1 %vm1528_vm1, %v1526_v7 }
  0x3e   :  { %1401 = vmatmul.mubr.msk.f32.gmra.mrb[26].mxu0 %vm48_vm0, %v22_v34 }
  0x3f   :  { %408 = vmatprep.mubr.f32.mxu0 %v1526_v7 }
  0x40   :  { %1446 = vmatmul.mubr.msk.f32.gmra.mrb[26].mxu1 %vm48_vm0, %v22_v34 }
  0x41   :  { %1448 = vmatprep.mubr.msk.f32.mxu1 %vm1528_vm1, %v1526_v7 }
  0x42   :  { %1402 = vmatmul.mubr.msk.f32.gmra.mrb[28].mxu0 %vm48_vm0, %v23_v35 }
  0x43   :  { %414 = vmatprep.mubr.f32.mxu0 %v1526_v7 }
  0x44   :  { %1449 = vmatmul.mubr.msk.f32.gmra.mrb[28].mxu1 %vm48_vm0, %v23_v35 }
  0x45   :  { %1451 = vmatprep.mubr.msk.f32.mxu1 %vm1528_vm1, %v1526_v7 }
  0x46   :  { %1403 = vmatmul.mubr.msk.f32.gmra.mrb[30].mxu0 %vm48_vm0, %v24_v36 }
  0x47   :  { %420 = vmatprep.mubr.f32.mxu0 %v1526_v7 }
  0x48   :  { %1452 = vmatmul.mubr.msk.f32.gmra.mrb[30].mxu1 %vm48_vm0, %v24_v36 }
  0x49   :  { %1454 = vmatprep.mubr.msk.f32.mxu1 %vm1528_vm1, %v1526_v7 }
  0x4a   :  { %1404 = vmatmul.mubr.msk.f32.gmra.mrb[32].mxu0 %vm48_vm0, %v25_v37 }
  0x4b   :  { %426 = vmatprep.mubr.f32.mxu0 %v1526_v7 }
  0x4c   :  { %1455 = vmatmul.mubr.msk.f32.gmra.mrb[32].mxu1 %vm48_vm0, %v25_v37 }
  0x4d   :  { %1457 = vmatprep.mubr.msk.f32.mxu1 %vm1528_vm1, %v1526_v7 }
  0x4e   :  { %1405 = vmatmul.mubr.msk.f32.gmra.mrb[34].mxu0 %vm48_vm0, %v26_v38 }
  0x50   :  { %1458 = vmatmul.mubr.msk.f32.gmra.mrb[34].mxu1 %vm48_vm0, %v26_v38 }
  0xdd   :  { %v1736_v39 = vpop.f32.mrb[0].mxu0 }
  0xde   :  { %v634_v40 = vmul.f32 %v1736_v39, %v1736_v39  ;;  %v1740_v41 = vpop.f32.mrb[1].mxu0 }
  0xdf   :  { %v543_v42 = vadd.f32 %v1740_v41, %v1736_v39  ;;  %v635_v43 = vmul.f32 %v1740_v41, %v1740_v41  ;;  %v1746_v44 = vpop.f32.mrb[0].mxu1 }
  0xe0   :  { %v636_v45 = vmul.f32 %v1746_v44, %v1746_v44  ;;  %v1750_v46 = vpop.f32.mrb[1].mxu1 }
  0xe1   :  { %v697_v47 = vadd.f32 %v635_v43, %v634_v40  ;;  %v544_v48 = vadd.f32 %v543_v42, %v1746_v44  ;;  %v1753_v49 = vpop.f32.mrb[2].mxu0  ;;  %v637_v51 = vmul.f32 %v1750_v46, %v1750_v46 }
  0xe2   :  { %v641_v50 = vmul.f32 %v1753_v49, %v1753_v49  ;;  %v1759_v52 = vpop.f32.mrb[3].mxu0 }
  0xe3   :  { %v698_v53 = vadd.f32 %v697_v47, %v636_v45  ;;  %v1762_v54 = vadd.f32 %v544_v48, %v1750_v46  ;;  %v553_v55 = vadd.f32 %v1759_v52, %v1753_v49  ;;  %v642_v56 = vmul.f32 %v1759_v52, %v1759_v52  ;;  %v1768_v57 = vpop.f32.mrb[2].mxu1 }
  0xe4   :  { %v643_v58 = vmul.f32 %v1768_v57, %v1768_v57  ;;  %v1772_v59 = vpop.f32.mrb[3].mxu1 }
  0xe5   :  { %v1774_v60 = vadd.f32 %v698_v53, %v637_v51  ;;  %v706_v61 = vadd.f32 %v642_v56, %v641_v50  ;;  %v554_v62 = vadd.f32 %v553_v55, %v1768_v57  ;;  %v1777_v63 = vpop.f32.mrb[4].mxu0  ;;  %v644_v1 = vmul.f32 %v1772_v59, %v1772_v59 }
  0xe6   :  { %v648_v0 = vmul.f32 %v1777_v63, %v1777_v63  ;;  %v1783_v2 = vpop.f32.mrb[5].mxu0 }
  0xe7   :  { %v707_v3 = vadd.f32 %v706_v61, %v643_v58  ;;  %v1786_v4 = vadd.f32 %v554_v62, %v1772_v59  ;;  %v562_v5 = vadd.f32 %v1783_v2, %v1777_v63  ;;  %v649_v6 = vmul.f32 %v1783_v2, %v1783_v2  ;;  %v1792_v7 = vpop.f32.mrb[4].mxu1 }
  0xe8   :  { %v650_v8 = vmul.f32 %v1792_v7, %v1792_v7  ;;  %v1796_v9 = vpop.f32.mrb[5].mxu1 }
  0xe9   :  { %v1798_v10 = vadd.f32 %v707_v3, %v644_v1  ;;  %v715_v11 = vadd.f32 %v649_v6, %v648_v0  ;;  %v563_v12 = vadd.f32 %v562_v5, %v1792_v7  ;;  %v160_v13 = vpop.f32.mrb[6].mxu0  ;;  %v651_v15 = vmul.f32 %v1796_v9, %v1796_v9 }
  0xea   :  { %v655_v14 = vmul.f32 %v160_v13, %v160_v13  ;;  %808 = vst [vmem:[#allocation2 + $0xa8] sm:$0xff] %v160_v13  ;;  %v162_v16 = vpop.f32.mrb[7].mxu0 }
  0xeb   :  { %v716_v17 = vadd.f32 %v715_v11, %v650_v8  ;;  %v1804_v18 = vadd.f32 %v563_v12, %v1796_v9  ;;  %v571_v19 = vadd.f32 %v162_v16, %v160_v13  ;;  %v656_v20 = vmul.f32 %v162_v16, %v162_v16  ;;  %809 = vst [vmem:[#allocation2 + $0xb0] sm:$0xff] %v162_v16  ;;  %v279_v21 = vpop.f32.mrb[6].mxu1 }
  0xec   :  { %v657_v22 = vmul.f32 %v279_v21, %v279_v21  ;;  %810 = vst [vmem:[#allocation2 + $0xb8] sm:$0xff] %v279_v21  ;;  %v281_v23 = vpop.f32.mrb[7].mxu1 }
  0xed   :  { %v1806_v24 = vadd.f32 %v716_v17, %v651_v15  ;;  %v724_v25 = vadd.f32 %v656_v20, %v655_v14  ;;  %v572_v26 = vadd.f32 %v571_v19, %v279_v21  ;;  %v166_v27 = vpop.f32.mrb[8].mxu0  ;;  %811 = vst [vmem:[#allocation2 + $0xc0] sm:$0xff] %v281_v23  ;;  %v658_v29 = vmul.f32 %v281_v23, %v281_v23 }
  0xee   :  { %v662_v28 = vmul.f32 %v166_v27, %v166_v27  ;;  %815 = vst [vmem:[#allocation2 + $0xe0] sm:$0xff] %v166_v27  ;;  %v168_v30 = vpop.f32.mrb[9].mxu0 }
  0xef   :  { %v725_v31 = vadd.f32 %v724_v25, %v657_v22  ;;  %v1808_v32 = vadd.f32 %v572_v26, %v281_v23  ;;  %v580_v33 = vadd.f32 %v168_v30, %v166_v27  ;;  %v663_v34 = vmul.f32 %v168_v30, %v168_v30  ;;  %816 = vst [vmem:[#allocation2 + $0xe8] sm:$0xff] %v168_v30  ;;  %v285_v35 = vpop.f32.mrb[8].mxu1 }
  0xf0   :  { %v664_v36 = vmul.f32 %v285_v35, %v285_v35  ;;  %817 = vst [vmem:[#allocation2 + $0xf0] sm:$0xff] %v285_v35  ;;  %v287_v37 = vpop.f32.mrb[9].mxu1 }
  0xf1   :  { %v1810_v38 = vadd.f32 %v725_v31, %v658_v29  ;;  %v733_v40 = vadd.f32 %v663_v34, %v662_v28  ;;  %v581_v42 = vadd.f32 %v580_v33, %v285_v35  ;;  %v172_v43 = vpop.f32.mrb[10].mxu0  ;;  %818 = vst [vmem:[#allocation2 + $0xf8] sm:$0xff] %v287_v37  ;;  %v665_v47 = vmul.f32 %v287_v37, %v287_v37 }
  0xf2   :  { %v669_v45 = vmul.f32 %v172_v43, %v172_v43  ;;  %822 = vst [vmem:[#allocation2 + $0x118] sm:$0xff] %v172_v43  ;;  %v174_v48 = vpop.f32.mrb[11].mxu0 }
  0xf3   :  { %v734_v50 = vadd.f32 %v733_v40, %v664_v36  ;;  %v1812_v51 = vadd.f32 %v581_v42, %v287_v37  ;;  %v589_v53 = vadd.f32 %v174_v48, %v172_v43  ;;  %v670_v55 = vmul.f32 %v174_v48, %v174_v48  ;;  %823 = vst [vmem:[#allocation2 + $0x120] sm:$0xff] %v174_v48  ;;  %v291_v56 = vpop.f32.mrb[10].mxu1 }
  0xf4   :  { %v671_v58 = vmul.f32 %v291_v56, %v291_v56  ;;  %824 = vst [vmem:[#allocation2 + $0x128] sm:$0xff] %v291_v56  ;;  %v293_v61 = vpop.f32.mrb[11].mxu1 }
  0xf5   :  { %v1814_v62 = vadd.f32 %v734_v50, %v665_v47  ;;  %v742_v0 = vadd.f32 %v670_v55, %v669_v45  ;;  %v590_v1 = vadd.f32 %v589_v53, %v291_v56  ;;  %v178_v3 = vpop.f32.mrb[12].mxu0  ;;  %825 = vst [vmem:[#allocation2 + $0x130] sm:$0xff] %v293_v61  ;;  %v672_v6 = vmul.f32 %v293_v61, %v293_v61 }
  0xf6   :  { %v676_v5 = vmul.f32 %v178_v3, %v178_v3  ;;  %829 = vst [vmem:[#allocation2 + $0x150] sm:$0xff] %v178_v3  ;;  %v180_v8 = vpop.f32.mrb[13].mxu0 }
  0xf7   :  { %v743_v11 = vadd.f32 %v742_v0, %v671_v58  ;;  %v1816_v12 = vadd.f32 %v590_v1, %v293_v61  ;;  %v598_v13 = vadd.f32 %v180_v8, %v178_v3  ;;  %v677_v14 = vmul.f32 %v180_v8, %v180_v8  ;;  %830 = vst [vmem:[#allocation2 + $0x158] sm:$0xff] %v180_v8  ;;  %v297_v15 = vpop.f32.mrb[12].mxu1 }
  0xf8   :  { %v678_v16 = vmul.f32 %v297_v15, %v297_v15  ;;  %831 = vst [vmem:[#allocation2 + $0x160] sm:$0xff] %v297_v15  ;;  %v299_v17 = vpop.f32.mrb[13].mxu1 }
  0xf9   :  { %v1818_v19 = vadd.f32 %v743_v11, %v672_v6  ;;  %v751_v20 = vadd.f32 %v677_v14, %v676_v5  ;;  %v599_v21 = vadd.f32 %v598_v13, %v297_v15  ;;  %v184_v22 = vpop.f32.mrb[14].mxu0  ;;  %832 = vst [vmem:[#allocation2 + $0x168] sm:$0xff] %v299_v17  ;;  %v679_v25 = vmul.f32 %v299_v17, %v299_v17 }
  0xfa   :  { %v683_v23 = vmul.f32 %v184_v22, %v184_v22  ;;  %836 = vst [vmem:[#allocation2 + $0x188] sm:$0xff] %v184_v22  ;;  %v186_v26 = vpop.f32.mrb[15].mxu0 }
  0xfb   :  { %v752_v27 = vadd.f32 %v751_v20, %v678_v16  ;;  %v1820_v28 = vadd.f32 %v599_v21, %v299_v17  ;;  %v607_v29 = vadd.f32 %v186_v26, %v184_v22  ;;  %v684_v30 = vmul.f32 %v186_v26, %v186_v26  ;;  %837 = vst [vmem:[#allocation2 + $0x190] sm:$0xff] %v186_v26  ;;  %v303_v31 = vpop.f32.mrb[14].mxu1 }
  0xfc   :  { %v685_v33 = vmul.f32 %v303_v31, %v303_v31  ;;  %838 = vst [vmem:[#allocation2 + $0x198] sm:$0xff] %v303_v31  ;;  %v305_v34 = vpop.f32.mrb[15].mxu1 }
  0xfd   :  { %v1822_v35 = vadd.f32 %v752_v27, %v679_v25  ;;  %v760_v36 = vadd.f32 %v684_v30, %v683_v23  ;;  %v608_v37 = vadd.f32 %v607_v29, %v303_v31  ;;  %v190_v40 = vpop.f32.mrb[16].mxu0  ;;  %839 = vst [vmem:[#allocation2 + $0x1a0] sm:$0xff] %v305_v34  ;;  %v686_v43 = vmul.f32 %v305_v34, %v305_v34 }
  0xfe   :  { %v690_v42 = vmul.f32 %v190_v40, %v190_v40  ;;  %843 = vst [vmem:[#allocation2 + $0x1c0] sm:$0xff] %v190_v40  ;;  %v192_v45 = vpop.f32.mrb[17].mxu0 }
  0xff   :  { %v761_v47 = vadd.f32 %v760_v36, %v685_v33  ;;  %v1824_v48 = vadd.f32 %v608_v37, %v305_v34  ;;  %v616_v50 = vadd.f32 %v192_v45, %v190_v40  ;;  %v691_v53 = vmul.f32 %v192_v45, %v192_v45  ;;  %844 = vst [vmem:[#allocation2 + $0x1c8] sm:$0xff] %v192_v45  ;;  %v309_v55 = vpop.f32.mrb[16].mxu1 }
 0x100   :  { %v692_v56 = vmul.f32 %v309_v55, %v309_v55  ;;  %845 = vst [vmem:[#allocation2 + $0x1d0] sm:$0xff] %v309_v55  ;;  %v311_v58 = vpop.f32.mrb[17].mxu1 }
 0x101   :  { %v1826_v61 = vadd.f32 %v761_v47, %v686_v43  ;;  %v769_v0 = vadd.f32 %v691_v53, %v690_v42  ;;  %v617_v1 = vadd.f32 %v616_v50, %v309_v55  ;;  %846 = vst [vmem:[#allocation2 + $0x1d8] sm:$0xff] %v311_v58  ;;  %v1828_v3 = vpop.f32.mrb[18].mxu0  ;;  %v693_v14 = vmul.f32 %v311_v58, %v311_v58 }
 0x102   :  { %v546_v5 = vadd.f32 %v1762_v54, %v1828_v3  ;;  %v638_v6 = vmul.f32 %v1828_v3, %v1828_v3  ;;  %v1834_v8 = vpop.f32.mrb[19].mxu0 }
 0x103   :  { %v770_v11 = vadd.f32 %v769_v0, %v692_v56  ;;  %v1836_v13 = vadd.f32 %v617_v1, %v311_v58  ;;  %v639_v15 = vmul.f32 %v1834_v8, %v1834_v8  ;;  %v499_v16 = vpop.f32.mrb[18].mxu1 }
 0x104   :  { %793 = vst.msk [vmem:[#allocation2 + $0x30] sm:$0xff] %vm548_vm2, %v499_v16  ;;  %v1435_v17 = vpop.f32.mrb[19].mxu1  ;;  %v547_v20 = vadd.f32 %v546_v5, %v1834_v8  ;;  %v549_v54 = vsel %vm548_vm2, %v499_v16, 0.0  ;;  %v640_v21 = vmul.f32 %v499_v16, %v499_v16  ;;  %v700_v22 = vadd.f32 %v1774_v60, %v638_v6 }
 0x105   :  { %v1844_v23 = vadd.f32 %v770_v11, %v693_v14  ;;  %v1846_v25 = vpop.f32.mrb[20].mxu0 }
 0x106   :  { %v556_v26 = vadd.f32 %v1786_v4, %v1846_v25  ;;  %v645_v27 = vmul.f32 %v1846_v25, %v1846_v25  ;;  %v1852_v29 = vpop.f32.mrb[21].mxu0  ;;  %v550_v30 = vadd.f32 %v549_v54, %v547_v20  ;;  %v701_v31 = vadd.f32 %v700_v22, %v639_v15 }
 0x107   :  { %v646_v33 = vmul.f32 %v1852_v29, %v1852_v29  ;;  %v504_v34 = vpop.f32.mrb[20].mxu1  ;;  %v702_v60 = vsel %vm548_vm2, %v640_v21, 0.0 }
 0x108   :  { %v647_v36 = vmul.f32 %v504_v34, %v504_v34  ;;  %800 = vst.msk [vmem:[#allocation2 + $0x68] sm:$0xff] %vm548_vm2, %v504_v34  ;;  %551 = vadd.xlane.f32.xlu0 %v550_v30  ;;  %v1438_v37 = vpop.f32.mrb[21].mxu1  ;;  %v703_v40 = vadd.f32 %v702_v60, %v701_v31  ;;  %v557_v4 = vadd.f32 %v556_v26, %v1852_v29  ;;  %v558_v42 = vsel %vm548_vm2, %v504_v34, 0.0 }
 0x109   :  { %v1860_v43 = vpop.f32.mrb[22].mxu0  ;;  %v709_v45 = vadd.f32 %v1798_v10, %v645_v27 }
 0x10a   :  { %v565_v47 = vadd.f32 %v1804_v18, %v1860_v43  ;;  %v652_v50 = vmul.f32 %v1860_v43, %v1860_v43  ;;  %704 = vadd.xlane.f32.xlu1 %v703_v40  ;;  %v1867_v53 = vpop.f32.mrb[23].mxu0  ;;  %v559_v55 = vadd.f32 %v558_v42, %v557_v4  ;;  %v711_v56 = vsel %vm548_vm2, %v647_v36, 0.0 }
 0x10b   :  { %v653_v58 = vmul.f32 %v1867_v53, %v1867_v53  ;;  %v509_v0 = vpop.f32.mrb[22].mxu1  ;;  %v710_v1 = vadd.f32 %v709_v45, %v646_v33 }
 0x10c   :  { %v654_v5 = vmul.f32 %v509_v0, %v509_v0  ;;  %807 = vst.msk [vmem:[#allocation2 + $0xa0] sm:$0xff] %vm548_vm2, %v509_v0  ;;  %560 = vadd.xlane.f32.xlu0 %v559_v55  ;;  %v1441_v10 = vpop.f32.mrb[23].mxu1  ;;  %v566_v18 = vadd.f32 %v565_v47, %v1867_v53  ;;  %v567_v6 = vsel %vm548_vm2, %v509_v0, 0.0  ;;  %v718_v11 = vadd.f32 %v1806_v24, %v652_v50 }
 0x10d   :  { %v1876_v14 = vpop.f32.mrb[24].mxu0  ;;  %v712_v15 = vadd.f32 %v711_v56, %v710_v1 }
 0x10e   :  { %v574_v16 = vadd.f32 %v1808_v32, %v1876_v14  ;;  %v659_v17 = vmul.f32 %v1876_v14, %v1876_v14  ;;  %v1882_v20 = vpop.f32.mrb[25].mxu0  ;;  %v568_v54 = vadd.f32 %v567_v6, %v566_v18  ;;  %v719_v21 = vadd.f32 %v718_v11, %v653_v58 }
 0x10f   :  { %v660_v22 = vmul.f32 %v1882_v20, %v1882_v20  ;;  %v514_v26 = vpop.f32.mrb[24].mxu1  ;;  %v720_v27 = vsel %vm548_vm2, %v654_v5, 0.0 }
 0x110   :  { %v661_v24 = vmul.f32 %v514_v26, %v514_v26  ;;  %814 = vst.msk [vmem:[#allocation2 + $0xd8] sm:$0xff] %vm548_vm2, %v514_v26  ;;  %713 = vadd.xlane.f32.xlu0 %v712_v15  ;;  %569 = vadd.xlane.f32.xlu1 %v568_v54  ;;  %v1444_v30 = vpop.f32.mrb[25].mxu1  ;;  %v721_v32 = vadd.f32 %v720_v27, %v719_v21  ;;  %v576_v33 = vsel %vm548_vm2, %v514_v26, 0.0 }
 0x111   :  { %v727_v31 = vadd.f32 %v1810_v38, %v659_v17  ;;  %v1890_v34 = vpop.f32.mrb[26].mxu0  ;;  %v575_v60 = vadd.f32 %v574_v16, %v1882_v20 }
 0x112   :  { %v583_v36 = vadd.f32 %v1812_v51, %v1890_v34  ;;  %v666_v37 = vmul.f32 %v1890_v34, %v1890_v34  ;;  %v1897_v40 = vpop.f32.mrb[27].mxu0  ;;  %v729_v42 = vsel %vm548_vm2, %v661_v24, 0.0 }
 0x113   :  { %v728_v4 = vadd.f32 %v727_v31, %v660_v22  ;;  %v667_v38 = vmul.f32 %v1897_v40, %v1897_v40  ;;  %v519_v45 = vpop.f32.mrb[26].mxu1  ;;  %v577_v47 = vadd.f32 %v576_v33, %v575_v60 }
 0x114   :  { %v668_v50 = vmul.f32 %v519_v45, %v519_v45  ;;  %821 = vst.msk [vmem:[#allocation2 + $0x110] sm:$0xff] %vm548_vm2, %v519_v45  ;;  %722 = vadd.xlane.f32.xlu1 %v721_v32  ;;  %v1447_v56 = vpop.f32.mrb[27].mxu1  ;;  %v584_v51 = vadd.f32 %v583_v36, %v1897_v40  ;;  %v585_v58 = vsel %vm548_vm2, %v519_v45, 0.0  ;;  %v736_v1 = vadd.f32 %v1814_v62, %v666_v37 }
 0x115   :  { %v730_v55 = vadd.f32 %v729_v42, %v728_v4  ;;  %v1905_v0 = vpop.f32.mrb[28].mxu0 }
 0x116   :  { %v592_v5 = vadd.f32 %v1816_v12, %v1905_v0  ;;  %v673_v10 = vmul.f32 %v1905_v0, %v1905_v0  ;;  %v1912_v18 = vpop.f32.mrb[29].mxu0  ;;  %v586_v6 = vadd.f32 %v585_v58, %v584_v51  ;;  %v738_v11 = vsel %vm548_vm2, %v668_v50, 0.0 }
 0x117   :  { %731 = vadd.xlane.f32.xlu0 %v730_v55  ;;  %v674_v15 = vmul.f32 %v1912_v18, %v1912_v18  ;;  %v524_v16 = vpop.f32.mrb[28].mxu1  ;;  %v737_v17 = vadd.f32 %v736_v1, %v667_v38 }
 0x118   :  { %v675_v54 = vmul.f32 %v524_v16, %v524_v16  ;;  %828 = vst.msk [vmem:[#allocation2 + $0x148] sm:$0xff] %vm548_vm2, %v524_v16  ;;  %578 = vadd.xlane.f32.xlu1 %v577_v47  ;;  %v1450_v62 = vpop.f32.mrb[29].mxu1  ;;  %v745_v12 = vadd.f32 %v1818_v19, %v673_v10  ;;  %v593_v21 = vadd.f32 %v592_v5, %v1912_v18  ;;  %v594_v22 = vsel %vm548_vm2, %v524_v16, 0.0 }
 0x119   :  { %v1921_v26 = vpop.f32.mrb[30].mxu0  ;;  %v739_v27 = vadd.f32 %v738_v11, %v737_v17 }
 0x11a   :  { %v601_v24 = vadd.f32 %v1820_v28, %v1921_v26  ;;  %v680_v30 = vmul.f32 %v1921_v26, %v1921_v26  ;;  %v1927_v32 = vpop.f32.mrb[31].mxu0  ;;  %v746_v31 = vadd.f32 %v745_v12, %v674_v15  ;;  %v747_v33 = vsel %vm548_vm2, %v675_v54, 0.0 }
 0x11b   :  { %587 = vadd.xlane.f32.xlu0 %v586_v6  ;;  %v681_v19 = vmul.f32 %v1927_v32, %v1927_v32  ;;  %v529_v60 = vpop.f32.mrb[30].mxu1  ;;  %v595_v36 = vadd.f32 %v594_v22, %v593_v21 }
 0x11c   :  { %v682_v37 = vmul.f32 %v529_v60, %v529_v60  ;;  %835 = vst.msk [vmem:[#allocation2 + $0x180] sm:$0xff] %vm548_vm2, %v529_v60  ;;  %740 = vadd.xlane.f32.xlu1 %v739_v27  ;;  %v748_v4 = vadd.f32 %v747_v33, %v746_v31  ;;  %v1453_v28 = vpop.f32.mrb[31].mxu1  ;;  %v602_v42 = vadd.f32 %v601_v24, %v1927_v32  ;;  %v603_v38 = vsel %vm548_vm2, %v529_v60, 0.0 }
 0x11d   :  { %v1935_v45 = vpop.f32.mrb[32].mxu0  ;;  %v754_v47 = vadd.f32 %v1822_v35, %v680_v30 }
 0x11e   :  { %v610_v50 = vadd.f32 %v1824_v48, %v1935_v45  ;;  %v687_v55 = vmul.f32 %v1935_v45, %v1935_v45  ;;  %v1942_v56 = vpop.f32.mrb[33].mxu0  ;;  %v604_v51 = vadd.f32 %v603_v38, %v602_v42  ;;  %v756_v58 = vsel %vm548_vm2, %v682_v37, 0.0 }
 0x11f   :  { %749 = vadd.xlane.f32.xlu0 %v748_v4  ;;  %v688_v1 = vmul.f32 %v1942_v56, %v1942_v56  ;;  %v534_v5 = vpop.f32.mrb[32].mxu1  ;;  %v755_v10 = vadd.f32 %v754_v47, %v681_v19  ;;  %v1529_v42 = vmov 0  }
 0x120   :  { %v689_v6 = vmul.f32 %v534_v5, %v534_v5  ;;  %842 = vst.msk [vmem:[#allocation2 + $0x1b8] sm:$0xff] %vm548_vm2, %v534_v5  ;;  %596 = vadd.xlane.f32.xlu1 %v595_v36  ;;  %v1456_v35 = vpop.f32.mrb[33].mxu1  ;;  %v611_v48 = vadd.f32 %v610_v50, %v1942_v56  ;;  %v612_v11 = vsel %vm548_vm2, %v534_v5, 0.0  ;;  %v763_v15 = vadd.f32 %v1826_v61, %v687_v55 }
 0x121   :  { %v1951_v16 = vpop.f32.mrb[34].mxu0  ;;  %v757_v17 = vadd.f32 %v756_v58, %v755_v10  ;;  %1482 = vset.pattern.permute.xlu0 %v1529_v42  ;;  %1483 = vset.pattern.permute.xlu1 %v1529_v42 }
 0x122   :  { %v619_v54 = vadd.f32 %v1836_v13, %v1951_v16  ;;  %v694_v62 = vmul.f32 %v1951_v16, %v1951_v16  ;;  %v1957_v12 = vpop.f32.mrb[35].mxu0  ;;  %v613_v21 = vadd.f32 %v612_v11, %v611_v48  ;;  %v764_v22 = vadd.f32 %v763_v15, %v688_v1 }
 0x123   :  { %605 = vadd.xlane.f32.xlu0 %v604_v51  ;;  %v695_v27 = vmul.f32 %v1957_v12, %v1957_v12  ;;  %v539_v24 = vpop.f32.mrb[34].mxu1  ;;  %v765_v61 = vsel %vm548_vm2, %v689_v6, 0.0 }
 0x124   :  { %v620_v30 = vadd.f32 %v619_v54, %v1957_v12  ;;  %v696_v31 = vmul.f32 %v539_v24, %v539_v24  ;;  %849 = vst.msk [vmem:[#allocation2 + $0x1f0] sm:$0xff] %vm548_vm2, %v539_v24  ;;  %758 = vadd.xlane.f32.xlu1 %v757_v17  ;;  %v621_v13 = vsel %vm548_vm2, %v539_v24, 0.0  ;;  %v772_v33 = vadd.f32 %v1844_v23, %v694_v62  ;;  %v1459_v19 = vpop.f32.mrb[35].mxu1 }
 0x125   :  { %v766_v60 = vadd.f32 %v765_v61, %v764_v22  ;;  %v913_v19 = vld [vmem:[%s2109_s2] sm:$0xff] }
 0x126   :  { %v622_v36 = vadd.f32 %v621_v13, %v620_v30  ;;  %v773_v37 = vadd.f32 %v772_v33, %v695_v27  ;;  %v774_v4 = vsel %vm548_vm2, %v696_v31, 0.0 }
 0x128   :  { %614 = vadd.xlane.f32.xlu1 %v613_v21  ;;  %623 = vadd.xlane.f32.xlu0 %v622_v36  ;;  %v775_v28 = vadd.f32 %v774_v4, %v773_v37 }
 0x12c   :  { %776 = vadd.xlane.f32.xlu1 %v775_v28  ;;  %767 = vadd.xlane.f32.xlu0 %v766_v60 }
 0x195   :  { %v552_v38 = vpop.xlane.xlu0 %551 }
 0x196   :  { %v850_v47 = vmul.f32 0.0012755102, %v552_v38 }
 0x197   :  { %v705_v50 = vpop.xlane.xlu1 %704 }
 0x198   :  { %v868_v55 = vmul.f32 %v850_v47, %v850_v47  ;;  %v859_v51 = vmul.f32 0.0012755102, %v705_v50 }
 0x199   :  { %v561_v23 = vpop.xlane.xlu0 %560 }
 0x19a   :  { %v877_v58 = vsub.f32 %v859_v51, %v868_v55  ;;  %v1967_v1 = vmul.f32 0.0012755102, %v561_v23 }
 0x19c   :  { %v886_v5 = vmax.f32 %v877_v58, 0.0  ;;  %v869_v48 = vmul.f32 %v1967_v1, %v1967_v1 }
 0x19d   :  { %v714_v10 = vpop.xlane.xlu0 %713  ;;  %v570_v6 = vpop.xlane.xlu1 %569 }
 0x19e   :  { %v895_v35 = vadd.f32 1e-05, %v886_v5  ;;  %v860_v11 = vmul.f32 0.0012755102, %v714_v10  ;;  %v1971_v15 = vmul.f32 0.0012755102, %v570_v6 }
 0x19f   :  { %v931_v10 = vld [vmem:[%s2110_s3] sm:$0xff] }
 0x1a0   :  { %1484 = vrsqrt.f32 %v895_v35  ;;  %v878_v17 = vsub.f32 %v860_v11, %v869_v48  ;;  %v870_v21 = vmul.f32 %v1971_v15, %v1971_v15 }
 0x1a1   :  { %v723_v54 = vpop.xlane.xlu1 %722 }
 0x1a2   :  { %v887_v62 = vmax.f32 %v878_v17, 0.0  ;;  %v861_v22 = vmul.f32 0.0012755102, %v723_v54  ;;  %v914_v54 = vld [vmem:[%s2109_s2 + $0x8] sm:$0xff] }
 0x1a4   :  { %v732_v27 = vpop.xlane.xlu0 %731  ;;  %v896_v24 = vadd.f32 1e-05, %v887_v62  ;;  %v879_v61 = vsub.f32 %v861_v22, %v870_v21 }
 0x1a5   :  { %v579_v30 = vpop.xlane.xlu1 %578  ;;  %v862_v36 = vmul.f32 0.0012755102, %v732_v27 }
 0x1a6   :  { %1486 = vrsqrt.f32 %v896_v24  ;;  %v888_v31 = vmax.f32 %v879_v61, 0.0  ;;  %v1975_v13 = vmul.f32 0.0012755102, %v579_v30 }
 0x1a8   :  { %v588_v33 = vpop.xlane.xlu0 %587  ;;  %v897_v60 = vadd.f32 1e-05, %v888_v31  ;;  %v871_v37 = vmul.f32 %v1975_v13, %v1975_v13 }
 0x1a9   :  { %v1982_v4 = vmul.f32 0.0012755102, %v588_v33  ;;  %v741_v28 = vpop.xlane.xlu1 %740 }
 0x1aa   :  { %v1485_v42 = vpop.eup %1484  ;;  %1488 = vrsqrt.f32 %v897_v60  ;;  %v880_v38 = vsub.f32 %v862_v36, %v871_v37  ;;  %v863_v55 = vmul.f32 0.0012755102, %v741_v28  ;;  %v915_v36 = vld [vmem:[%s2109_s2 + $0x10] sm:$0xff] }
 0x1ab   :  { %v872_v50 = vmul.f32 %v1982_v4, %v1982_v4  ;;  %v922_v23 = vmul.f32 %v1485_v42, %v913_v19 }
 0x1ac   :  { %v750_v51 = vpop.xlane.xlu0 %749  ;;  %v889_v58 = vmax.f32 %v880_v38, 0.0 }
 0x1ad   :  { %v881_v5 = vsub.f32 %v863_v55, %v872_v50  ;;  %v597_v6 = vpop.xlane.xlu1 %596  ;;  %1023 = vperm.xlu0 %1482, %v922_v23   ;;  %v940_v35 = vmul.f32 %v922_v23, %v850_v47  ;;  %v864_v62 = vmul.f32 0.0012755102, %v750_v51 }
 0x1ae   :  { %v898_v48 = vadd.f32 1e-05, %v889_v58  ;;  %v1989_v17 = vmul.f32 0.0012755102, %v597_v6 }
 0x1af   :  { %v890_v11 = vmax.f32 %v881_v5, 0.0  ;;  %v949_v22 = vsub.f32 %v931_v10, %v940_v35  ;;  %v932_v5 = vld [vmem:[%s2110_s3 + $0x8] sm:$0xff]  ;;  %v933_v10 = vld [vmem:[%s2110_s3 + $0x10] sm:$0xff] }
 0x1b0   :  { %v606_v21 = vpop.xlane.xlu0 %605  ;;  %v1487_v27 = vpop.eup %1486  ;;  %1490 = vrsqrt.f32 %v898_v48  ;;  %v873_v61 = vmul.f32 %v1989_v17, %v1989_v17 }
 0x1b1   :  { %v899_v24 = vadd.f32 1e-05, %v890_v11  ;;  %v1996_v30 = vmul.f32 0.0012755102, %v606_v21  ;;  %v759_v47 = vpop.xlane.xlu1 %758  ;;  %1131 = vperm.xlu0 %1482, %v949_v22   ;;  %v923_v31 = vmul.f32 %v1487_v27, %v914_v54 }
 0x1b2   :  { %v882_v33 = vsub.f32 %v864_v62, %v873_v61  ;;  %v865_v60 = vmul.f32 0.0012755102, %v759_v47 }
 0x1b3   :  { %1492 = vrsqrt.f32 %v899_v24  ;;  %v874_v19 = vmul.f32 %v1996_v30, %v1996_v30  ;;  %1028 = vperm.xlu1 %1483, %v923_v31   ;;  %v941_v51 = vmul.f32 %v923_v31, %v1967_v1  ;;  %v916_v24 = vld [vmem:[%s2109_s2 + $0x18] sm:$0xff] }
 0x1b4   :  { %v1489_v37 = vpop.eup %1488  ;;  %v891_v28 = vmax.f32 %v882_v33, 0.0 }
 0x1b5   :  { %v883_v42 = vsub.f32 %v865_v60, %v874_v19  ;;  %v615_v38 = vpop.xlane.xlu1 %614  ;;  %v624_v50 = vpop.xlane.xlu0 %623  ;;  %v924_v55 = vmul.f32 %v1489_v37, %v915_v36  ;;  %v950_v21 = vsub.f32 %v932_v5, %v941_v51  ;;  %v934_v5 = vld [vmem:[%s2110_s3 + $0x18] sm:$0xff] }
 0x1b6   :  { %v2004_v58 = vmul.f32 0.0012755102, %v615_v38  ;;  %v858_v6 = vmul.f32 0.0012755102, %v624_v50  ;;  %v900_v48 = vadd.f32 1e-05, %v891_v28 }
 0x1b7   :  { %v892_v23 = vmax.f32 %v883_v42, 0.0  ;;  %1033 = vperm.xlu1 %1483, %v924_v55   ;;  %v942_v35 = vmul.f32 %v924_v55, %v1971_v15  ;;  %v917_v15 = vld [vmem:[%s2109_s2 + $0x20] sm:$0xff] }
 0x1b8   :  { %v875_v1 = vmul.f32 %v2004_v58, %v2004_v58  ;;  %v876_v61 = vmul.f32 %v858_v6, %v858_v6  ;;  %v935_v42 = vld [vmem:[%s2110_s3 + $0x20] sm:$0xff] }
 0x1b9   :  { %v901_v11 = vadd.f32 1e-05, %v892_v23  ;;  %v777_v54 = vpop.xlane.xlu1 %776  ;;  %v768_v62 = vpop.xlane.xlu0 %767  ;;  %v951_v22 = vsub.f32 %v933_v10, %v942_v35  ;;  %v919_v10 = vld [vmem:[%s2109_s2 + $0x30] sm:$0xff] }
 0x1ba   :  { %v1491_v27 = vpop.eup %1490  ;;  %v867_v47 = vmul.f32 0.0012755102, %v777_v54  ;;  %v866_v31 = vmul.f32 0.0012755102, %v768_v62  ;;  %v937_v54 = vld [vmem:[%s2110_s3 + $0x30] sm:$0xff] }
 0x1bb   :  { %1494 = vrsqrt.f32 %v901_v11  ;;  %1136 = vperm.xlu1 %1483, %v950_v21   ;;  %1141 = vperm.xlu0 %1482, %v951_v22   ;;  %v925_v36 = vmul.f32 %v1491_v27, %v916_v24  ;;  %v921_v27 = vld [vmem:[%s2109_s2 + $0x40] sm:$0xff] }
 0x1bc   :  { %1496 = vrsqrt.f32 %v900_v48  ;;  %v885_v19 = vsub.f32 %v867_v47, %v876_v61  ;;  %v884_v60 = vsub.f32 %v866_v31, %v875_v1  ;;  %v936_v31 = vld [vmem:[%s2110_s3 + $0x28] sm:$0xff] }
 0x1bd   :  { %v1493_v33 = vpop.eup %1492  ;;  %v943_v51 = vmul.f32 %v925_v36, %v1975_v13  ;;  %v918_v13 = vld [vmem:[%s2109_s2 + $0x28] sm:$0xff] }
 0x1be   :  { %v926_v37 = vmul.f32 %v1493_v33, %v917_v15  ;;  %v894_v28 = vmax.f32 %v885_v19, 0.0  ;;  %v893_v55 = vmax.f32 %v884_v60, 0.0 }
 0x1bf   :  { %1038 = vperm.xlu1 %1483, %v925_v36   ;;  %v952_v11 = vsub.f32 %v934_v5, %v943_v51  ;;  %v920_v36 = vld [vmem:[%s2109_s2 + $0x38] sm:$0xff]  ;;  %s1530_s2 = smov [#allocation2]  }
 0x1c0   :  { %v944_v38 = vmul.f32 %v926_v37, %v1982_v4  ;;  %v903_v50 = vadd.f32 1e-05, %v894_v28  ;;  %v902_v48 = vadd.f32 1e-05, %v893_v55  ;;  %v938_v28 = vld [vmem:[%s2110_s3 + $0x38] sm:$0xff] }
 0x1c2   :  { %v953_v23 = vsub.f32 %v935_v42, %v944_v38  ;;  %1498 = vrsqrt.f32 %v903_v50  ;;  %v964_v38 = vld [vmem:[#allocation2 + $0x30] sm:$0xff] }
 0x1c3   :  { %1043 = vperm.xlu1 %1483, %v926_v37   ;;  %1500 = vrsqrt.f32 %v902_v48 }
 0x1c4   :  { %1151 = vperm.xlu0 %1482, %v953_v23  }
 0x1c5   :  { %v1495_v35 = vpop.eup %1494 }
 0x1c6   :  { %v928_v4 = vmul.f32 %v1495_v35, %v919_v10  ;;  %v1497_v1 = vpop.eup %1496 }
 0x1c7   :  { %1146 = vperm.xlu1 %1483, %v952_v11   ;;  %v927_v21 = vmul.f32 %v1497_v1, %v918_v13 }
 0x1c8   :  { %v946_v62 = vmul.f32 %v928_v4, %v1996_v30  ;;  %v939_v30 = vld [vmem:[%s2110_s3 + $0x40] sm:$0xff]  ;;  %s1368_s3 = sshll.u32 %s1530_s2, 4  ;;  %s1369_s3 = int_to_ptr.vmem [resolvable:$true] %s1368_s3 }
 0x1c9   :  { %v945_v61 = vmul.f32 %v927_v21, %v1989_v17  ;;  %s1502_s29 = scalar_lea.vmem %s1369_s3, 8064  ;;  %p1507_p1 = scmp.lt.s32.totalorder %s1369_s3, %s1369_s3 }
 0x1ca   :  { %v955_v22 = vsub.f32 %v937_v54, %v946_v62  ;;  %p1503_p0 = scmp.ne.s32.totalorder %s1369_s3, %s1502_s29  ;;  %p1508_p2 = scmp.lt.s32.totalorder %s1502_s29, %s1502_s29 }
 0x1cb   :  { %1048 = vperm.xlu1 %1483, %v927_v21   ;;  %v954_v33 = vsub.f32 %v936_v31, %v945_v61 }
 0x1cc   :  { %1161 = vperm.xlu0 %1482, %v955_v22   ;;  %v1499_v24 = vpop.eup %1498  ;;  %p1509_p3 = por %p1508_p2, %p1507_p1 }
 0x1cd   :  { %v930_v47 = vmul.f32 %v1499_v24, %v921_v27  ;;  %v1501_v60 = vpop.eup %1500 }
 0x1ce   :  { %v929_v17 = vmul.f32 %v1501_v60, %v920_v36  ;;  %v978_v60 = vld [vmem:[#allocation2 + $0xa0] sm:$0xff]  ;;  %p1510_p4 = pnand %p1509_p3, %p1503_p0 }
 0x1cf   :  { %1053 = vperm.xlu1 %1483, %v928_v4   ;;  %v948_v15 = vmul.f32 %v930_v47, %v858_v6 }
 0x1d0   :  { %v947_v37 = vmul.f32 %v929_v17, %v2004_v58 }
 0x1d1   :  { %v957_v19 = vsub.f32 %v939_v30, %v948_v15 }
 0x1d2   :  { %v956_v42 = vsub.f32 %v938_v28, %v947_v37 }
 0x1d3   :  { %1156 = vperm.xlu1 %1483, %v954_v33   ;;  %1171 = vperm.xlu0 %1482, %v957_v19  }
 0x1d7   :  { %1058 = vperm.xlu1 %1483, %v929_v17  }
 0x1db   :  { %1063 = vperm.xlu1 %1483, %v930_v47   ;;  %v971_v47 = vld [vmem:[#allocation2 + $0x68] sm:$0xff] }
 0x1df   :  { %1166 = vperm.xlu1 %1483, %v956_v42  }
 0x22c   :  { %v1024_v6 = vpop.permute.xlu0 %1023 }
 0x22d   :  { %v1066_v50 = vmul.f32 %v1024_v6, %v1736_v39  ;;  %v1067_v55 = vmul.f32 %v1024_v6, %v1740_v41  ;;  %v1068_v51 = vmul.f32 %v1024_v6, %v1746_v44  ;;  %v1069_v23 = vmul.f32 %v1024_v6, %v1750_v46 }
 0x22e   :  { %v1070_v5 = vmul.f32 %v1024_v6, %v1828_v3  ;;  %v1071_v58 = vmul.f32 %v1024_v6, %v1834_v8  ;;  %v1072_v10 = vmul.f32 %v1024_v6, %v964_v38 }
 0x230   :  { %v1132_v35 = vpop.permute.xlu0 %1131 }
 0x231   :  { %v1174_v48 = vadd.f32 %v1132_v35, %v1066_v50  ;;  %v1175_v11 = vadd.f32 %v1132_v35, %v1067_v55  ;;  %v1176_v4 = vadd.f32 %v1132_v35, %v1068_v51  ;;  %v1177_v1 = vadd.f32 %v1132_v35, %v1069_v23 }
 0x232   :  { %v1178_v13 = vadd.f32 %v1132_v35, %v1070_v5  ;;  %v1179_v54 = vadd.f32 %v1132_v35, %v1071_v58  ;;  %v1180_v62 = vadd.f32 %v1132_v35, %v1072_v10  ;;  %v1029_v39 = vpop.permute.xlu1 %1028 }
 0x233   :  { %v1237_v21 = vmax.f32 %v1174_v48, 0.0  ;;  %v1238_v41 = vmax.f32 %v1175_v11, 0.0  ;;  %v1239_v22 = vmax.f32 %v1176_v4, 0.0  ;;  %v1240_v44 = vmax.f32 %v1177_v1, 0.0 }
 0x234   :  { %v1241_v27 = vmax.f32 %v1178_v13, 0.0  ;;  %v1242_v46 = vmax.f32 %v1179_v54, 0.0  ;;  %v1243_v24 = vmax.f32 %v1180_v62, 0.0  ;;  %v1073_v8 = vmul.f32 %v1029_v39, %v1753_v49  ;;  %v979_v62 = vld [vmem:[#allocation2 + $0xa8] sm:$0xff] }
 0x235   :  { %1300 = vst [vmem:[#allocation2] sm:$0xff] %v1237_v21  ;;  %1301 = vst [vmem:[#allocation2 + $0x8] sm:$0xff] %v1238_v41  ;;  %v1074_v61 = vmul.f32 %v1029_v39, %v1759_v52  ;;  %v1075_v31 = vmul.f32 %v1029_v39, %v1768_v57  ;;  %v1076_v30 = vmul.f32 %v1029_v39, %v1772_v59 }
 0x236   :  { %1302 = vst [vmem:[#allocation2 + $0x10] sm:$0xff] %v1239_v22  ;;  %1303 = vst [vmem:[#allocation2 + $0x18] sm:$0xff] %v1240_v44  ;;  %v1034_v3 = vpop.permute.xlu1 %1033  ;;  %v1077_v15 = vmul.f32 %v1029_v39, %v1846_v25  ;;  %v1078_v33 = vmul.f32 %v1029_v39, %v1852_v29  ;;  %v1079_v19 = vmul.f32 %v1029_v39, %v971_v47  ;;  %v980_v44 = vld [vmem:[#allocation2 + $0xb0] sm:$0xff]  ;;  %v986_v47 = vld [vmem:[#allocation2 + $0xe0] sm:$0xff] }
 0x237   :  { %1304 = vst [vmem:[#allocation2 + $0x20] sm:$0xff] %v1241_v27  ;;  %1305 = vst [vmem:[#allocation2 + $0x28] sm:$0xff] %v1242_v46  ;;  %v1080_v36 = vmul.f32 %v1034_v3, %v1777_v63  ;;  %v1081_v17 = vmul.f32 %v1034_v3, %v1783_v2  ;;  %v1082_v37 = vmul.f32 %v1034_v3, %v1792_v7  ;;  %v981_v27 = vld [vmem:[#allocation2 + $0xb8] sm:$0xff] }
 0x238   :  { %1306 = vst.msk [vmem:[#allocation2 + $0x30] sm:$0xff] %vm548_vm2, %v1243_v24  ;;  %v1083_v49 = vmul.f32 %v1034_v3, %v1796_v9  ;;  %v1084_v52 = vmul.f32 %v1034_v3, %v1860_v43  ;;  %v1085_v57 = vmul.f32 %v1034_v3, %v1867_v53  ;;  %v1086_v28 = vmul.f32 %v1034_v3, %v978_v60  ;;  %v982_v24 = vld [vmem:[#allocation2 + $0xc0] sm:$0xff]  ;;  %v988_v60 = vld [vmem:[#allocation2 + $0xf0] sm:$0xff] }
 0x23a   :  { %v1137_v59 = vpop.permute.xlu1 %1136  ;;  %v1142_v42 = vpop.permute.xlu0 %1141 }
 0x23b   :  { %v1181_v25 = vadd.f32 %v1137_v59, %v1073_v8  ;;  %v1182_v6 = vadd.f32 %v1137_v59, %v1074_v61  ;;  %v1183_v29 = vadd.f32 %v1137_v59, %v1075_v31  ;;  %v1184_v38 = vadd.f32 %v1137_v59, %v1076_v30 }
 0x23c   :  { %v1185_v50 = vadd.f32 %v1137_v59, %v1077_v15  ;;  %v1186_v55 = vadd.f32 %v1137_v59, %v1078_v33  ;;  %v1187_v63 = vadd.f32 %v1137_v59, %v1079_v19  ;;  %v1188_v51 = vadd.f32 %v1142_v42, %v1080_v36  ;;  %v987_v19 = vld [vmem:[#allocation2 + $0xe8] sm:$0xff]  ;;  %v989_v36 = vld [vmem:[#allocation2 + $0xf8] sm:$0xff] }
 0x23d   :  { %v1244_v2 = vmax.f32 %v1181_v25, 0.0  ;;  %v1245_v23 = vmax.f32 %v1182_v6, 0.0  ;;  %v1246_v7 = vmax.f32 %v1183_v29, 0.0  ;;  %v1247_v5 = vmax.f32 %v1184_v38, 0.0 }
 0x23e   :  { %v1248_v9 = vmax.f32 %v1185_v50, 0.0  ;;  %v1249_v58 = vmax.f32 %v1186_v55, 0.0  ;;  %v1250_v43 = vmax.f32 %v1187_v63, 0.0  ;;  %v1189_v10 = vadd.f32 %v1142_v42, %v1081_v17  ;;  %v1039_v53 = vpop.permute.xlu1 %1038 }
 0x23f   :  { %1307 = vst [vmem:[#allocation2 + $0x38] sm:$0xff] %v1244_v2  ;;  %1308 = vst [vmem:[#allocation2 + $0x40] sm:$0xff] %v1245_v23  ;;  %v1190_v35 = vadd.f32 %v1142_v42, %v1082_v37  ;;  %v1191_v48 = vadd.f32 %v1142_v42, %v1083_v49  ;;  %v1192_v11 = vadd.f32 %v1142_v42, %v1084_v52  ;;  %v1251_v13 = vmax.f32 %v1188_v51, 0.0  ;;  %v985_v37 = vld [vmem:[#allocation2 + $0xd8] sm:$0xff]  ;;  %v992_v49 = vld [vmem:[#allocation2 + $0x110] sm:$0xff] }
 0x240   :  { %1309 = vst [vmem:[#allocation2 + $0x48] sm:$0xff] %v1246_v7  ;;  %1310 = vst [vmem:[#allocation2 + $0x50] sm:$0xff] %v1247_v5  ;;  %v1193_v4 = vadd.f32 %v1142_v42, %v1085_v57  ;;  %v1194_v1 = vadd.f32 %v1142_v42, %v1086_v28  ;;  %v1252_v54 = vmax.f32 %v1189_v10, 0.0  ;;  %v1087_v3 = vmul.f32 %v1039_v53, %v979_v62 }
 0x241   :  { %1311 = vst [vmem:[#allocation2 + $0x58] sm:$0xff] %v1248_v9  ;;  %1312 = vst [vmem:[#allocation2 + $0x60] sm:$0xff] %v1249_v58  ;;  %v1253_v39 = vmax.f32 %v1190_v35, 0.0  ;;  %v1254_v21 = vmax.f32 %v1191_v48, 0.0  ;;  %v1255_v41 = vmax.f32 %v1192_v11, 0.0  ;;  %v1088_v8 = vmul.f32 %v1039_v53, %v980_v44  ;;  %v993_v44 = vld [vmem:[#allocation2 + $0x118] sm:$0xff] }
 0x242   :  { %1313 = vst.msk [vmem:[#allocation2 + $0x68] sm:$0xff] %vm548_vm2, %v1250_v43  ;;  %v1256_v22 = vmax.f32 %v1193_v4, 0.0  ;;  %v1257_v46 = vmax.f32 %v1194_v1, 0.0  ;;  %1314 = vst [vmem:[#allocation2 + $0x70] sm:$0xff] %v1251_v13  ;;  %v1089_v61 = vmul.f32 %v1039_v53, %v981_v27  ;;  %v1044_v31 = vpop.permute.xlu1 %1043  ;;  %v1090_v30 = vmul.f32 %v1039_v53, %v982_v24  ;;  %v994_v27 = vld [vmem:[#allocation2 + $0x120] sm:$0xff]  ;;  %v996_v24 = vld [vmem:[#allocation2 + $0x130] sm:$0xff] }
 0x243   :  { %1315 = vst [vmem:[#allocation2 + $0x78] sm:$0xff] %v1252_v54  ;;  %1316 = vst [vmem:[#allocation2 + $0x80] sm:$0xff] %v1253_v39  ;;  %v1091_v15 = vmul.f32 %v1039_v53, %v1876_v14  ;;  %v1092_v33 = vmul.f32 %v1039_v53, %v1882_v20  ;;  %v1094_v17 = vmul.f32 %v1044_v31, %v986_v47  ;;  %v1152_v42 = vpop.permute.xlu0 %1151 }
 0x244   :  { %1317 = vst [vmem:[#allocation2 + $0x88] sm:$0xff] %v1254_v21  ;;  %1318 = vst [vmem:[#allocation2 + $0x90] sm:$0xff] %v1255_v41  ;;  %v1095_v52 = vmul.f32 %v1044_v31, %v987_v19  ;;  %v1096_v57 = vmul.f32 %v1044_v31, %v988_v60  ;;  %v1097_v28 = vmul.f32 %v1044_v31, %v989_v36  ;;  %v1003_v19 = vld [vmem:[#allocation2 + $0x168] sm:$0xff]  ;;  %v1006_v36 = vld [vmem:[#allocation2 + $0x180] sm:$0xff] }
 0x245   :  { %1319 = vst [vmem:[#allocation2 + $0x98] sm:$0xff] %v1256_v22  ;;  %1320 = vst.msk [vmem:[#allocation2 + $0xa0] sm:$0xff] %vm548_vm2, %v1257_v46  ;;  %v1098_v59 = vmul.f32 %v1044_v31, %v1890_v34  ;;  %v1093_v25 = vmul.f32 %v1039_v53, %v985_v37  ;;  %v1099_v6 = vmul.f32 %v1044_v31, %v1897_v40  ;;  %v995_v46 = vld [vmem:[#allocation2 + $0x128] sm:$0xff] }
 0x246   :  { %v1100_v14 = vmul.f32 %v1044_v31, %v992_v49  ;;  %v1202_v29 = vadd.f32 %v1152_v42, %v1094_v17  ;;  %v1203_v20 = vadd.f32 %v1152_v42, %v1095_v52  ;;  %v1204_v38 = vadd.f32 %v1152_v42, %v1096_v57  ;;  %v1147_v63 = vpop.permute.xlu1 %1146 }
 0x247   :  { %v1205_v50 = vadd.f32 %v1152_v42, %v1097_v28  ;;  %v1206_v55 = vadd.f32 %v1152_v42, %v1098_v59  ;;  %v1207_v51 = vadd.f32 %v1152_v42, %v1099_v6  ;;  %v1195_v7 = vadd.f32 %v1147_v63, %v1087_v3  ;;  %v999_v6 = vld [vmem:[#allocation2 + $0x148] sm:$0xff] }
 0x248   :  { %v1208_v2 = vadd.f32 %v1152_v42, %v1100_v14  ;;  %v1265_v23 = vmax.f32 %v1202_v29, 0.0  ;;  %v1266_v5 = vmax.f32 %v1203_v20, 0.0  ;;  %v1267_v9 = vmax.f32 %v1204_v38, 0.0 }
 0x249   :  { %v1268_v58 = vmax.f32 %v1205_v50, 0.0  ;;  %v1269_v43 = vmax.f32 %v1206_v55, 0.0  ;;  %v1270_v34 = vmax.f32 %v1207_v51, 0.0  ;;  %v1196_v53 = vadd.f32 %v1147_v63, %v1088_v8  ;;  %v1000_v8 = vld [vmem:[#allocation2 + $0x150] sm:$0xff] }
 0x24a   :  { %v1271_v10 = vmax.f32 %v1208_v2, 0.0  ;;  %1328 = vst [vmem:[#allocation2 + $0xe0] sm:$0xff] %v1265_v23  ;;  %v1197_v40 = vadd.f32 %v1147_v63, %v1089_v61  ;;  %1329 = vst [vmem:[#allocation2 + $0xe8] sm:$0xff] %v1266_v5  ;;  %v1198_v35 = vadd.f32 %v1147_v63, %v1090_v30  ;;  %v1199_v48 = vadd.f32 %v1147_v63, %v1091_v15  ;;  %v1049_v1 = vpop.permute.xlu1 %1048  ;;  %v1001_v15 = vld [vmem:[#allocation2 + $0x158] sm:$0xff] }
 0x24b   :  { %1330 = vst [vmem:[#allocation2 + $0xf0] sm:$0xff] %v1267_v9  ;;  %1331 = vst [vmem:[#allocation2 + $0xf8] sm:$0xff] %v1268_v58  ;;  %v1200_v11 = vadd.f32 %v1147_v63, %v1092_v33  ;;  %v1201_v4 = vadd.f32 %v1147_v63, %v1093_v25  ;;  %v1258_v13 = vmax.f32 %v1195_v7, 0.0  ;;  %v1259_v54 = vmax.f32 %v1196_v53, 0.0  ;;  %v1002_v33 = vld [vmem:[#allocation2 + $0x160] sm:$0xff]  ;;  %v1162_v28 = vpop.permute.xlu0 %1161 }
 0x24c   :  { %1332 = vst [vmem:[#allocation2 + $0x100] sm:$0xff] %v1269_v43  ;;  %1333 = vst [vmem:[#allocation2 + $0x108] sm:$0xff] %v1270_v34  ;;  %v1260_v62 = vmax.f32 %v1197_v40, 0.0  ;;  %v1261_v39 = vmax.f32 %v1198_v35, 0.0  ;;  %v1262_v21 = vmax.f32 %v1199_v48, 0.0  ;;  %v1101_v3 = vmul.f32 %v1049_v1, %v993_v44  ;;  %v1010_v44 = vld [vmem:[#allocation2 + $0x1a0] sm:$0xff] }
 0x24d   :  { %1334 = vst.msk [vmem:[#allocation2 + $0x110] sm:$0xff] %vm548_vm2, %v1271_v10  ;;  %v1263_v41 = vmax.f32 %v1200_v11, 0.0  ;;  %v1264_v22 = vmax.f32 %v1201_v4, 0.0  ;;  %1321 = vst [vmem:[#allocation2 + $0xa8] sm:$0xff] %v1258_v13  ;;  %v1102_v61 = vmul.f32 %v1049_v1, %v994_v27  ;;  %v1103_v47 = vmul.f32 %v1049_v1, %v995_v46  ;;  %v1015_v46 = vld [vmem:[#allocation2 + $0x1c8] sm:$0xff] }
 0x24e   :  { %1322 = vst [vmem:[#allocation2 + $0xb0] sm:$0xff] %v1259_v54  ;;  %1323 = vst [vmem:[#allocation2 + $0xb8] sm:$0xff] %v1260_v62  ;;  %v1104_v31 = vmul.f32 %v1049_v1, %v996_v24  ;;  %v1105_v30 = vmul.f32 %v1049_v1, %v1905_v0  ;;  %v1054_v60 = vpop.permute.xlu1 %1053  ;;  %v1106_v57 = vmul.f32 %v1049_v1, %v1912_v18  ;;  %v1016_v24 = vld [vmem:[#allocation2 + $0x1d0] sm:$0xff] }
 0x24f   :  { %1324 = vst [vmem:[#allocation2 + $0xc0] sm:$0xff] %v1261_v39  ;;  %1325 = vst [vmem:[#allocation2 + $0xc8] sm:$0xff] %v1262_v21  ;;  %v1108_v17 = vmul.f32 %v1054_v60, %v1000_v8  ;;  %v1109_v37 = vmul.f32 %v1054_v60, %v1001_v15  ;;  %v1110_v49 = vmul.f32 %v1054_v60, %v1002_v33  ;;  %v1007_v39 = vld [vmem:[#allocation2 + $0x188] sm:$0xff]  ;;  %v1008_v21 = vld [vmem:[#allocation2 + $0x190] sm:$0xff] }
 0x250   :  { %1326 = vst [vmem:[#allocation2 + $0xd0] sm:$0xff] %v1263_v41  ;;  %1327 = vst.msk [vmem:[#allocation2 + $0xd8] sm:$0xff] %vm548_vm2, %v1264_v22  ;;  %v1111_v52 = vmul.f32 %v1054_v60, %v1003_v19  ;;  %v1112_v59 = vmul.f32 %v1054_v60, %v1921_v26  ;;  %v1113_v42 = vmul.f32 %v1054_v60, %v1927_v32  ;;  %v1014_v41 = vld [vmem:[#allocation2 + $0x1c0] sm:$0xff]  ;;  %v1009_v22 = vld [vmem:[#allocation2 + $0x198] sm:$0xff] }
 0x251   :  { %v1114_v25 = vmul.f32 %v1054_v60, %v1006_v36  ;;  %v1216_v14 = vadd.f32 %v1162_v28, %v1108_v17  ;;  %v1217_v0 = vadd.f32 %v1162_v28, %v1109_v37  ;;  %v1218_v29 = vadd.f32 %v1162_v28, %v1110_v49  ;;  %v1020_v15 = vld [vmem:[#allocation2 + $0x1f0] sm:$0xff] }
 0x252   :  { %v1219_v20 = vadd.f32 %v1162_v28, %v1111_v52  ;;  %v1107_v38 = vmul.f32 %v1049_v1, %v999_v6  ;;  %v1220_v50 = vadd.f32 %v1162_v28, %v1112_v59  ;;  %v1221_v55 = vadd.f32 %v1162_v28, %v1113_v42  ;;  %v1157_v51 = vpop.permute.xlu1 %1156  ;;  %v1172_v17 = vpop.permute.xlu0 %1171  ;;  %v1013_v6 = vld [vmem:[#allocation2 + $0x1b8] sm:$0xff] }
 0x253   :  { %v1222_v63 = vadd.f32 %v1162_v28, %v1114_v25  ;;  %v1279_v2 = vmax.f32 %v1216_v14, 0.0  ;;  %v1280_v23 = vmax.f32 %v1217_v0, 0.0  ;;  %v1281_v7 = vmax.f32 %v1218_v29, 0.0 }
 0x254   :  { %v1282_v18 = vmax.f32 %v1219_v20, 0.0  ;;  %v1283_v5 = vmax.f32 %v1220_v50, 0.0  ;;  %v1284_v9 = vmax.f32 %v1221_v55, 0.0  ;;  %v1209_v58 = vadd.f32 %v1157_v51, %v1101_v3  ;;  %v1017_v3 = vld [vmem:[#allocation2 + $0x1d8] sm:$0xff] }
 0x255   :  { %v1285_v26 = vmax.f32 %v1222_v63, 0.0  ;;  %1342 = vst [vmem:[#allocation2 + $0x150] sm:$0xff] %v1279_v2  ;;  %1343 = vst [vmem:[#allocation2 + $0x158] sm:$0xff] %v1280_v23  ;;  %v1210_v32 = vadd.f32 %v1157_v51, %v1102_v61  ;;  %v1211_v43 = vadd.f32 %v1157_v51, %v1103_v47  ;;  %v1212_v34 = vadd.f32 %v1157_v51, %v1104_v31 }
 0x256   :  { %1344 = vst [vmem:[#allocation2 + $0x160] sm:$0xff] %v1281_v7  ;;  %1345 = vst [vmem:[#allocation2 + $0x168] sm:$0xff] %v1282_v18  ;;  %v1213_v10 = vadd.f32 %v1157_v51, %v1105_v30  ;;  %v1214_v53 = vadd.f32 %v1157_v51, %v1106_v57  ;;  %v1215_v40 = vadd.f32 %v1157_v51, %v1107_v38  ;;  %v1272_v35 = vmax.f32 %v1209_v58, 0.0  ;;  %v1059_v48 = vpop.permute.xlu1 %1058 }
 0x257   :  { %1346 = vst [vmem:[#allocation2 + $0x170] sm:$0xff] %v1283_v5  ;;  %1347 = vst [vmem:[#allocation2 + $0x178] sm:$0xff] %v1284_v9  ;;  %v1273_v11 = vmax.f32 %v1210_v32, 0.0  ;;  %v1274_v4 = vmax.f32 %v1211_v43, 0.0  ;;  %v1275_v1 = vmax.f32 %v1212_v34, 0.0  ;;  %v1115_v27 = vmul.f32 %v1059_v48, %v1007_v39 }
 0x258   :  { %1348 = vst.msk [vmem:[#allocation2 + $0x180] sm:$0xff] %vm548_vm2, %v1285_v26  ;;  %v1276_v13 = vmax.f32 %v1213_v10, 0.0  ;;  %v1277_v54 = vmax.f32 %v1214_v53, 0.0  ;;  %v1278_v62 = vmax.f32 %v1215_v40, 0.0  ;;  %1335 = vst [vmem:[#allocation2 + $0x118] sm:$0xff] %v1272_v35  ;;  %v1116_v61 = vmul.f32 %v1059_v48, %v1008_v21 }
 0x259   :  { %1336 = vst [vmem:[#allocation2 + $0x120] sm:$0xff] %v1273_v11  ;;  %1337 = vst [vmem:[#allocation2 + $0x128] sm:$0xff] %v1274_v4  ;;  %v1117_v47 = vmul.f32 %v1059_v48, %v1009_v22  ;;  %v1118_v31 = vmul.f32 %v1059_v48, %v1010_v44  ;;  %v1119_v30 = vmul.f32 %v1059_v48, %v1935_v45 }
 0x25a   :  { %1338 = vst [vmem:[#allocation2 + $0x130] sm:$0xff] %v1275_v1  ;;  %1339 = vst [vmem:[#allocation2 + $0x138] sm:$0xff] %v1276_v13  ;;  %v1064_v8 = vpop.permute.xlu1 %1063  ;;  %v1120_v57 = vmul.f32 %v1059_v48, %v1942_v56  ;;  %v1121_v29 = vmul.f32 %v1059_v48, %v1013_v6 }
 0x25b   :  { %1340 = vst [vmem:[#allocation2 + $0x140] sm:$0xff] %v1277_v54  ;;  %1341 = vst.msk [vmem:[#allocation2 + $0x148] sm:$0xff] %vm548_vm2, %v1278_v62  ;;  %v1122_v33 = vmul.f32 %v1064_v8, %v1014_v41  ;;  %v1123_v19 = vmul.f32 %v1064_v8, %v1015_v46  ;;  %v1124_v60 = vmul.f32 %v1064_v8, %v1016_v24 }
 0x25c   :  { %v1125_v36 = vmul.f32 %v1064_v8, %v1017_v3  ;;  %v1126_v37 = vmul.f32 %v1064_v8, %v1951_v16  ;;  %v1127_v49 = vmul.f32 %v1064_v8, %v1957_v12  ;;  %v1128_v52 = vmul.f32 %v1064_v8, %v1020_v15 }
 0x25d   :  { %v1230_v28 = vadd.f32 %v1172_v17, %v1122_v33  ;;  %v1231_v59 = vadd.f32 %v1172_v17, %v1123_v19  ;;  %v1232_v42 = vadd.f32 %v1172_v17, %v1124_v60 }
 0x25e   :  { %v1233_v25 = vadd.f32 %v1172_v17, %v1125_v36  ;;  %v1234_v14 = vadd.f32 %v1172_v17, %v1126_v37  ;;  %v1235_v45 = vadd.f32 %v1172_v17, %v1127_v49  ;;  %v1236_v0 = vadd.f32 %v1172_v17, %v1128_v52  ;;  %v1167_v20 = vpop.permute.xlu1 %1166 }
 0x25f   :  { %v1293_v38 = vmax.f32 %v1230_v28, 0.0  ;;  %v1294_v50 = vmax.f32 %v1231_v59, 0.0  ;;  %v1295_v55 = vmax.f32 %v1232_v42, 0.0  ;;  %v1223_v2 = vadd.f32 %v1167_v20, %v1115_v27 }
 0x260   :  { %v1296_v63 = vmax.f32 %v1233_v25, 0.0  ;;  %v1297_v16 = vmax.f32 %v1234_v14, 0.0  ;;  %v1298_v51 = vmax.f32 %v1235_v45, 0.0  ;;  %v1299_v12 = vmax.f32 %v1236_v0, 0.0 }
 0x261   :  { %1356 = vst [vmem:[#allocation2 + $0x1c0] sm:$0xff] %v1293_v38  ;;  %1357 = vst [vmem:[#allocation2 + $0x1c8] sm:$0xff] %v1294_v50  ;;  %v1224_v56 = vadd.f32 %v1167_v20, %v1116_v61  ;;  %v1225_v23 = vadd.f32 %v1167_v20, %v1117_v47  ;;  %v1226_v7 = vadd.f32 %v1167_v20, %v1118_v31  ;;  %v1286_v26 = vmax.f32 %v1223_v2, 0.0 }
 0x262   :  { %1358 = vst [vmem:[#allocation2 + $0x1d0] sm:$0xff] %v1295_v55  ;;  %1359 = vst [vmem:[#allocation2 + $0x1d8] sm:$0xff] %v1296_v63  ;;  %v1227_v18 = vadd.f32 %v1167_v20, %v1119_v30  ;;  %v1228_v5 = vadd.f32 %v1167_v20, %v1120_v57  ;;  %v1229_v9 = vadd.f32 %v1167_v20, %v1121_v29 }
 0x263   :  { %1360 = vst [vmem:[#allocation2 + $0x1e0] sm:$0xff] %v1297_v16  ;;  %1361 = vst [vmem:[#allocation2 + $0x1e8] sm:$0xff] %v1298_v51  ;;  %v1287_v58 = vmax.f32 %v1224_v56, 0.0  ;;  %v1288_v32 = vmax.f32 %v1225_v23, 0.0  ;;  %v1289_v43 = vmax.f32 %v1226_v7, 0.0 }
 0x264   :  { %1362 = vst.msk [vmem:[#allocation2 + $0x1f0] sm:$0xff] %vm548_vm2, %v1299_v12  ;;  %v1290_v34 = vmax.f32 %v1227_v18, 0.0  ;;  %v1291_v10 = vmax.f32 %v1228_v5, 0.0  ;;  %v1292_v53 = vmax.f32 %v1229_v9, 0.0  ;;  %1349 = vst [vmem:[#allocation2 + $0x188] sm:$0xff] %v1286_v26 }
 0x265   :  { %1350 = vst [vmem:[#allocation2 + $0x190] sm:$0xff] %v1287_v58  ;;  %1351 = vst [vmem:[#allocation2 + $0x198] sm:$0xff] %v1288_v32 }
 0x266   :  { %1352 = vst [vmem:[#allocation2 + $0x1a0] sm:$0xff] %v1289_v43  ;;  %1353 = vst [vmem:[#allocation2 + $0x1a8] sm:$0xff] %v1290_v34 }
 0x267   :  { %1354 = vst [vmem:[#allocation2 + $0x1b0] sm:$0xff] %v1291_v10  ;;  %1355 = vst.msk [vmem:[#allocation2 + $0x1b8] sm:$0xff] %vm548_vm2, %v1292_v53 }
 0x268   :  { %1513 = shalt.err (!%p1510_p4)
}
 0x269   :  { %s1514_s6 = scalar_lea.hbm %s2111_s4, 8064 }
 0x26a   :  { %p1515_p5 = scmp.ne.s32.totalorder %s2111_s4, %s1514_s6  ;;  %p1518_p6 = scmp.lt.u32.totalorder %s1514_s6, %s2111_s4 }
 0x26c   :  { %p1520_p7 = pnand %p1518_p6, %p1515_p5 }
 0x26e   :  { %1523 = shalt.err (!%p1520_p7)
}
 0x26f   :  { %s1531_s11 = smov 896   ;;  %s1532_s12 = smov 56  }
 0x270   :  { %1374 = dma.vmem_to_hbm [thread:$0]  %s1369_s3, 8064, %s2111_s4, [#allocation3], %s1531_s11, %s1531_s11, %s1532_s12  }
 0x271   :  { %1524 = dma.done.wait [#allocation3], 8064  }
 0x272   :  { %1525 = vsyncadd [#allocation3], 4294959232 }
 0x273   :  { %1378 = vsyncpa [#allocation3], 1 }

</bundles_post_ra>
